<compile_context>
chip_gen: v7x
topology: tpu7x:2x2x1
jax: 0.10.0
libtpu: 0.0.40
codegen_flags: <defaults>
</compile_context>

<pallas_src>
import functools

import jax
import jax.numpy as jnp
from jax.experimental import pallas as pl
from jax.experimental.pallas import tpu as pltpu


def _round_up(x: int, m: int) -> int:
    return (x + m - 1) // m * m


def fuse_classifier_kernel(x_ref, w_ref, b_ref, o_ref):
    # x_ref: (TB, S, D)   one batch tile
    # w_ref: (D, C_pad)   fused weight  (Wp @ Wc / S), grid-invariant
    # b_ref: (1, C_pad)   fused bias    (bp @ Wc + bc), grid-invariant
    # o_ref: (TB, C_pad)  lane-dense output slab
    xs = jnp.sum(x_ref[...], axis=1)                    # (TB, D), seq-sum (XLU)
    out = jnp.dot(xs, w_ref[...],
                  preferred_element_type=jnp.float32)   # (TB, C_pad) on MXU
    o_ref[...] = (out + b_ref[...]).astype(o_ref.dtype)


@functools.partial(jax.jit, static_argnames=("input_dtype",))
def fuse_classifier(x, w_proj, b_proj, w_cls, b_cls, input_dtype=None):
    """Forward pass of FuseClassifier.

    x:      [B, S, D] activations
    w_proj: [D, D] (in, out), b_proj: [D]
    w_cls:  [D, C] (in, out), b_cls:  [C]
    input_dtype: optional MXU input dtype (e.g. jnp.bfloat16 on v5e/v6e);
                 accumulation is always f32.
    returns [B, C]
    """
    B, S, D = x.shape
    C = w_cls.shape[1]
    out_dtype = x.dtype

    # ---- Algebraic fusion (done once, outside the kernel, in f32) ----------
    # mean(x@Wp+bp)@Wc+bc == sum(x,1) @ (Wp@Wc/S) + (bp@Wc + bc)
    w_fused = jnp.dot(w_proj.astype(jnp.float32),
                      w_cls.astype(jnp.float32)) / jnp.float32(S)      # (D, C)
    b_fused = (jnp.dot(b_proj.astype(jnp.float32),
                       w_cls.astype(jnp.float32))
               + b_cls.astype(jnp.float32))                            # (C,)

    # ---- Pad C to a multiple of 128 for lane-dense (unmasked) stores -------
    C_pad = _round_up(C, 128)
    if C_pad != C:
        w_fused = jnp.pad(w_fused, ((0, 0), (0, C_pad - C)))
        b_fused = jnp.pad(b_fused, ((0, C_pad - C),))
    b_fused = b_fused.reshape(1, C_pad)

    # ---- Batch tiling: TB rows per grid step, pad B up to a multiple -------
    TB = min(256, _round_up(B, 8))
    B_pad = _round_up(B, TB)
    if B_pad != B:
        x = jnp.pad(x, ((0, B_pad - B), (0, 0), (0, 0)))

    # Optional bf16 MXU operands (keep f32 accumulation inside the kernel).
    if input_dtype is not None:
        x = x.astype(input_dtype)
        w_fused = w_fused.astype(input_dtype)

    # ---- VMEM budget: actual double-buffered tile footprint + headroom -----
    isz_x = jnp.dtype(x.dtype).itemsize
    isz_w = jnp.dtype(w_fused.dtype).itemsize
    need = (TB * S * D * isz_x * 2      # x tile, double-buffered
            + D * C_pad * isz_w * 2     # fused weight
            + C_pad * 4 * 2             # fused bias
            + TB * C_pad * 4 * 2)       # output tile
    vmem_limit = int(min(64 * 1024 * 1024, max(32 * 1024 * 1024, need * 3 // 2)))

    out_padded = pl.pallas_call(
        fuse_classifier_kernel,
        out_shape=jax.ShapeDtypeStruct((B_pad, C_pad), out_dtype),
        grid_spec=pltpu.PrefetchScalarGridSpec(
            num_scalar_prefetch=0,
            grid=(B_pad // TB,),
            in_specs=[
                pl.BlockSpec((TB, S, D), lambda b: (b, 0, 0)),   # x batch tile
                pl.BlockSpec((D, C_pad), lambda b: (0, 0)),      # fused weight
                pl.BlockSpec((1, C_pad), lambda b: (0, 0)),      # fused bias
            ],
            out_specs=pl.BlockSpec((TB, C_pad), lambda b: (b, 0)),
        ),
        compiler_params=pltpu.CompilerParams(
            dimension_semantics=("parallel",),   # shards over 2 TCs on v7x
            vmem_limit_bytes=vmem_limit,
        ),
    )(x, w_fused, b_fused)

    # Strip batch / class padding.
    return out_padded[:B, :C]


def fuse_classifier_ref(x, w_proj, b_proj, w_cls, b_cls):
    # Pure-JAX reference matching the PyTorch forward exactly (unfused math).
    h = jnp.einsum("bsd,de->bse", x, w_proj) + b_proj
    m = h.mean(axis=1)
    return jnp.dot(m, w_cls) + b_cls


if __name__ == "__main__":
    # Small shapes consistent with the module: batch=2, seq=8, hidden=32, classes=4
    B, S, D, C = 2, 8, 32, 4

    key = jax.random.PRNGKey(0)
    kx, kwp, kbp, kwc, kbc = jax.random.split(key, 5)

    x = jax.random.normal(kx, (B, S, D), dtype=jnp.float32)

    # Synthetic params stored directly as [in, out] (PyTorch stores [out, in];
    # a real port would transpose nn.Linear.weight once in the wrapper).
    w_proj = jax.random.normal(kwp, (D, D), dtype=jnp.float32) * 0.1
    b_proj = jax.random.normal(kbp, (D,), dtype=jnp.float32) * 0.1
    w_cls = jax.random.normal(kwc, (D, C), dtype=jnp.float32) * 0.1
    b_cls = jax.random.normal(kbc, (C,), dtype=jnp.float32) * 0.1

    out = fuse_classifier(x, w_proj, b_proj, w_cls, b_cls)
    out = jax.block_until_ready(out)

    ref = fuse_classifier_ref(x, w_proj, b_proj, w_cls, b_cls)
    assert out.shape == (B, C), out.shape
    # Fused (Wp@Wc, 1/S-folded) math reorders FP summation slightly.
    assert jnp.allclose(out, ref, atol=1e-4, rtol=1e-4), (out, ref)

    print("KERNEL_OK")
</pallas_src>

<mosaic_0001>
module attributes {stable_mosaic.version = 11 : i64} {
  func.func @fuse_classifier_kernel(%arg0: i32, %arg1: memref<8x8x32xf32, #tpu.memory_space<vmem>>, %arg2: memref<32x128xf32, #tpu.memory_space<vmem>>, %arg3: memref<1x128xf32, #tpu.memory_space<vmem>>, %arg4: memref<8x128xf32, #tpu.memory_space<vmem>>) attributes {dimension_semantics = [#tpu.dimension_semantics<parallel>], iteration_bounds = array<i64: 1>, scalar_prefetch = 0 : i64, scratch_operands = 0 : i64, tpu.core_type = #tpu.core_type<tc>, window_params = [{transform_indices = @transform_0, window_bounds = array<i64: 8, 8, 32>}, {pipeline_mode = #tpu.pipeline_mode<synchronous>, transform_indices = @transform_1, window_bounds = array<i64: 32, 128>}, {pipeline_mode = #tpu.pipeline_mode<synchronous>, transform_indices = @transform_2, window_bounds = array<i64: 1, 128>}, {transform_indices = @transform_3, window_bounds = array<i64: 8, 128>}]} {
    %c0 = arith.constant 0 : index
    %c0_0 = arith.constant 0 : index
    %c0_1 = arith.constant 0 : index
    %0 = vector.load %arg1[%c0, %c0_0, %c0_1] : memref<8x8x32xf32, #tpu.memory_space<vmem>>, vector<8x8x32xf32>
    %cst = arith.constant dense<0.000000e+00> : vector<8x32xf32>
    %1 = vector.multi_reduction <add>, %0, %cst [1] : vector<8x8x32xf32> to vector<8x32xf32>
    %c0_2 = arith.constant 0 : index
    %c0_3 = arith.constant 0 : index
    %2 = vector.load %arg2[%c0_2, %c0_3] : memref<32x128xf32, #tpu.memory_space<vmem>>, vector<32x128xf32>
    %cst_4 = arith.constant dense<0.000000e+00> : vector<8x128xf32>
    %3 = tpu.matmul %1, %2, %cst_4 {dimension_numbers = #tpu.dot_dimension_numbers<[1], [0], [0], [1], [0, 0, 1, 1], [], []>} : vector<8x32xf32>, vector<32x128xf32>, vector<8x128xf32> -> vector<8x128xf32>
    %c0_5 = arith.constant 0 : index
    %c0_6 = arith.constant 0 : index
    %4 = vector.load %arg3[%c0_5, %c0_6] : memref<1x128xf32, #tpu.memory_space<vmem>>, vector<1x128xf32>
    %5 = vector.broadcast %4 : vector<1x128xf32> to vector<8x128xf32>
    %6 = arith.addf %3, %5 : vector<8x128xf32>
    %c0_7 = arith.constant 0 : index
    %c0_8 = arith.constant 0 : index
    %7 = vector.load %arg4[%c0_7, %c0_8] : memref<8x128xf32, #tpu.memory_space<vmem>>, vector<8x128xf32>
    tpu.vector_store %arg4[%c0_7, %c0_8], %6 {strides = array<i32>} : memref<8x128xf32, #tpu.memory_space<vmem>>, vector<8x128xf32>,
    return
  }
  func.func @transform_0(%arg0: i32) -> (i32, i32, i32) {
    %c0_i32 = arith.constant 0 : i32
    %c0_i32_0 = arith.constant 0 : i32
    %c0_i32_1 = arith.constant 0 : i32
    return %arg0, %c0_i32, %c0_i32_0 : i32, i32, i32
  }
  func.func @transform_1(%arg0: i32) -> (i32, i32) {
    %c0_i32 = arith.constant 0 : i32
    %c0_i32_0 = arith.constant 0 : i32
    %c0_i32_1 = arith.constant 0 : i32
    return %c0_i32, %c0_i32_0 : i32, i32
  }
  func.func @transform_2(%arg0: i32) -> (i32, i32) {
    %c0_i32 = arith.constant 0 : i32
    %c0_i32_0 = arith.constant 0 : i32
    %c0_i32_1 = arith.constant 0 : i32
    return %c0_i32, %c0_i32_0 : i32, i32
  }
  func.func @transform_3(%arg0: i32) -> (i32, i32) {
    %c0_i32 = arith.constant 0 : i32
    %c0_i32_0 = arith.constant 0 : i32
    return %arg0, %c0_i32 : i32, i32
  }
}

</mosaic_0001>

<bundles_post_ra>
// kernel: fuse_classifier.1
= control target key start
LH: loop header
LB: loop body
LE: loop exit
PB: predicated region body
PF: predicated region fallthrough
CT: control target
= control target key end

     0   :  { %vm22_vm0 = vcmask 261120   ;;  %v216_v0 = vmov 0.0|0.0   ;;  %vm217_vm1 = vmmov 0   ;;  %v218_v4 = vmov 0.0   ;;  %s294_s1 = inlined_call_operand.vmem [shape: f32[32,128], index: 1, kind: input, shape index: {}]   ;;  %s295_s0 = inlined_call_operand.vmem [shape: f32[8,8,32], index: 0, kind: input, shape index: {}]   ;;  %s296_s2 = inlined_call_operand.vmem [shape: f32[1,128], index: 2, kind: input, shape index: {}]   ;;  %s297_s3 = inlined_call_operand.vmem [shape: f32[8,128], index: 3, kind: output, shape index: {}]  }
   0x1   :  { %207 = vmatprep.subr.bf16.mxu0 %v216_v0  ;;  %v79_v1 = vld [vmem:[%s294_s1] sm:$0xff]  ;;  %v80_v2 = vld [vmem:[%s294_s1 + $0x8] sm:$0xff]  ;;  %v81_v3 = vld [vmem:[%s294_s1 + $0x10] sm:$0xff]  ;;  %204 = vmatprep.mubr.msk.f32.mxu0 %vm217_vm1, %v218_v4  ;;  %vm98_vm2 = vcmask 1041409   ;;  %vm100_vm3 = vcmask 1042434   ;;  %vm102_vm4 = vcmask 1043459  }
   0x2   :  { %v208_v5 = vpack.c.bf16 %v80_v2, %v79_v1  ;;  %v82_v6 = vld [vmem:[%s294_s1 + $0x18] sm:$0xff]  ;;  %v14_v7 = vld [vmem:[%s295_s0] sm:$0xff]  ;;  %v15_v8 = vld [vmem:[%s295_s0 + $0x8] sm:$0xff]  ;;  %vm104_vm5 = vcmask 1044484   ;;  %vm106_vm6 = vcmask 1045509   ;;  %vm108_vm7 = vcmask 1046534  }
   0x3   :  { %v16_v9 = vld [vmem:[%s295_s0 + $0x10] sm:$0xff]  ;;  %v17_v10 = vld [vmem:[%s295_s0 + $0x18] sm:$0xff]  ;;  %v18_v11 = vld [vmem:[%s295_s0 + $0x20] sm:$0xff]  ;;  %v23_v12 = vsel %vm22_vm0, %v14_v7, 0.0  ;;  %v30_v13 = vsel %vm22_vm0, %v15_v8, 0.0  ;;  %v211_v14 = vpack.c.bf16 %v82_v6, %v81_v3  ;;  %vm110_vm8 = vcmask 1047559  }
   0x4   :  { %209 = vmatpush3.bf16.msra.mxu0 %v208_v5  ;;  %v19_v15 = vld [vmem:[%s295_s0 + $0x28] sm:$0xff]  ;;  %v20_v16 = vld [vmem:[%s295_s0 + $0x30] sm:$0xff]  ;;  %v21_v17 = vld [vmem:[%s295_s0 + $0x38] sm:$0xff]  ;;  %v24_v18 = vrot.slane %v23_v12, 4  ;;  %v31_v19 = vrot.slane %v30_v13, 4  ;;  %v37_v20 = vsel %vm22_vm0, %v16_v9, 0.0 }
   0x5   :  { %210 = vmatprep.subr.bf16.mxu0 %v216_v0  ;;  %v38_v21 = vrot.slane %v37_v20, 4  ;;  %v44_v22 = vsel %vm22_vm0, %v17_v10, 0.0  ;;  %v51_v23 = vsel %vm22_vm0, %v18_v11, 0.0  ;;  %v58_v24 = vsel %vm22_vm0, %v19_v15, 0.0  ;;  %v189_v15 = vld [vmem:[%s296_s2] ss:$0 sm:$0xff] }
   0x6   :  { %v25_v25 = vadd.f32 %v24_v18, %v23_v12  ;;  %v32_v26 = vadd.f32 %v31_v19, %v30_v13  ;;  %v45_v27 = vrot.slane %v44_v22, 4  ;;  %v52_v28 = vrot.slane %v51_v23, 4 }
   0x7   :  { %v39_v29 = vadd.f32 %v38_v21, %v37_v20  ;;  %v59_v30 = vrot.slane %v58_v24, 4  ;;  %v65_v31 = vsel %vm22_vm0, %v20_v16, 0.0  ;;  %v72_v32 = vsel %vm22_vm0, %v21_v17, 0.0 }
   0x8   :  { %212 = vmatpush3.bf16.msra.mxu0 %v211_v14  ;;  %v26_v33 = vrot.slane %v25_v25, 2  ;;  %v33_v34 = vrot.slane %v32_v26, 2  ;;  %v46_v35 = vadd.f32 %v45_v27, %v44_v22  ;;  %v53_v36 = vadd.f32 %v52_v28, %v51_v23 }
   0x9   :  { %v40_v37 = vrot.slane %v39_v29, 2  ;;  %v60_v38 = vadd.f32 %v59_v30, %v58_v24  ;;  %v66_v39 = vrot.slane %v65_v31, 4  ;;  %v73_v40 = vrot.slane %v72_v32, 4 }
   0xa   :  { %v27_v41 = vadd.f32 %v26_v33, %v25_v25  ;;  %v34_v42 = vadd.f32 %v33_v34, %v32_v26  ;;  %v47_v43 = vrot.slane %v46_v35, 2  ;;  %v54_v44 = vrot.slane %v53_v36, 2 }
   0xb   :  { %v41_v45 = vadd.f32 %v40_v37, %v39_v29  ;;  %v61_v46 = vrot.slane %v60_v38, 2  ;;  %v67_v47 = vadd.f32 %v66_v39, %v65_v31  ;;  %v74_v48 = vadd.f32 %v73_v40, %v72_v32 }
   0xc   :  { %v28_v49 = vrot.slane %v27_v41, 1  ;;  %v35_v50 = vrot.slane %v34_v42, 1  ;;  %v48_v51 = vadd.f32 %v47_v43, %v46_v35  ;;  %v55_v52 = vadd.f32 %v54_v44, %v53_v36 }
   0xd   :  { %v42_v53 = vrot.slane %v41_v45, 1  ;;  %v62_v54 = vadd.f32 %v61_v46, %v60_v38  ;;  %v68_v55 = vrot.slane %v67_v47, 2  ;;  %v75_v56 = vrot.slane %v74_v48, 2 }
   0xe   :  { %v29_v57 = vadd.f32 %v28_v49, %v27_v41  ;;  %v36_v58 = vadd.f32 %v35_v50, %v34_v42  ;;  %v49_v59 = vrot.slane %v48_v51, 1  ;;  %v56_v60 = vrot.slane %v55_v52, 1 }
   0xf   :  { %v43_v61 = vadd.f32 %v42_v53, %v41_v45  ;;  %v63_v62 = vrot.slane %v62_v54, 1  ;;  %v69_v63 = vadd.f32 %v68_v55, %v67_v47  ;;  %v76_v0 = vadd.f32 %v75_v56, %v74_v48 }
  0x10   :  { %v50_v1 = vadd.f32 %v49_v59, %v48_v51  ;;  %v57_v2 = vadd.f32 %v56_v60, %v55_v52  ;;  %v99_v3 = vsel %vm98_vm2, %v36_v58, %v29_v57 }
  0x11   :  { %v64_v4 = vadd.f32 %v63_v62, %v62_v54  ;;  %v70_v5 = vrot.slane %v69_v63, 1  ;;  %v77_v6 = vrot.slane %v76_v0, 1  ;;  %v101_v7 = vsel %vm100_vm3, %v43_v61, %v99_v3 }
  0x12   :  { %v103_v8 = vsel %vm102_vm4, %v50_v1, %v101_v7 }
  0x13   :  { %v71_v9 = vadd.f32 %v70_v5, %v69_v63  ;;  %v78_v10 = vadd.f32 %v77_v6, %v76_v0  ;;  %v105_v11 = vsel %vm104_vm5, %v57_v2, %v103_v8 }
  0x14   :  { %v107_v12 = vsel %vm106_vm6, %v64_v4, %v105_v11 }
  0x15   :  { %v109_v13 = vsel %vm108_vm7, %v71_v9, %v107_v12 }
  0x16   :  { %v111_v14 = vsel %vm110_vm8, %v78_v10, %v109_v13 }
  0x17   :  { %205 = vmatmul.mubr.msk.f32.vlgmr.msra.gmra.mrb[0].mxu0 %vm22_vm0, %v111_v14 }
  0xea   :  { %v180_v16 = vpop.f32.mrb[0].mxu0 }
  0xeb   :  { %v181_v17 = vadd.f32 %v189_v15, %v180_v16  ;;  %v206_v18 = vpop.f32.mrb[1].mxu0 }
  0xed   :  { %184 = vst [vmem:[%s297_s3] sm:$0xff] %v181_v17 }

</bundles_post_ra>
